<compile_context>
chip_gen: v7x
topology: tpu7x:2x2x1
jax: 0.10.0
libtpu: 0.0.40
codegen_flags: <defaults>
</compile_context>

<pallas_src>
import jax
import jax.numpy as jnp
from jax.experimental import pallas as pl
from jax.experimental.pallas import tpu as pltpu


def _round_up(x, m):
    return ((x + m - 1) // m) * m


def _mlp_kernel(x_ref, w1_ref, b1_ref, w2_ref, b2_ref, o_ref, acc_ref):
    """One (i, j, k) grid step of the fused MLP.

    x_ref  : (TM, NXp)  row tile of the input (same block across j, k)
    w1_ref : (NXp, TK)  K-slice of c_fc weight
    b1_ref : (1,  TK)   K-slice of c_fc bias (fp32)
    w2_ref : (TK, TN)   (K, N) tile of c_proj weight
    b2_ref : (1,  TN)   N-slice of c_proj bias (fp32)
    o_ref  : (TM, TN)   output tile (written on the last K step only)
    acc_ref: (TM, TN)   fp32 accumulator scratch
    """
    k = pl.program_id(2)

    @pl.when(k == 0)
    def _init():
        acc_ref[...] = jnp.zeros_like(acc_ref)

    # c_fc K-slice: (TM, NX) @ (NX, TK) -> fp32 on the MXU.
    h = jnp.dot(x_ref[...], w1_ref[...], preferred_element_type=jnp.float32)
    h = h + b1_ref[...]                    # (TM, TK) + (1, TK) broadcast
    # ReLUSquaredActivation, done in fp32 before any downcast.
    h = jnp.maximum(h, 0.0)
    h = h * h
    # c_proj partial product, accumulated in fp32.
    acc_ref[...] += jnp.dot(h.astype(w2_ref.dtype), w2_ref[...],
                            preferred_element_type=jnp.float32)

    @pl.when(k == pl.num_programs(2) - 1)
    def _finalize():
        # dropout (eval mode) == identity.
        o_ref[...] = (acc_ref[...] + b2_ref[...]).astype(o_ref.dtype)


def mlp_parallel_forward(hidden_states, w_fc, b_fc, w_proj, b_proj, *,
                         tm=256, tn=256, tk=512,
                         compute_dtype=None,
                         vmem_limit_bytes=48 * 1024 * 1024):
    """Fused forward pass of MLPParallel.

    hidden_states: (..., nx)
    w_fc:   (nx, nf)    b_fc:   (nf,)      (Conv1D stores weight transposed)
    w_proj: (nf, n_out) b_proj: (n_out,)
    compute_dtype: optionally cast x/W1/W2 (e.g. jnp.bfloat16) for the MXU;
    accumulation stays fp32.
    """
    orig_shape = hidden_states.shape
    out_dtype = hidden_states.dtype
    nx = orig_shape[-1]
    nf = w_fc.shape[1]
    n_out = w_proj.shape[1]
    assert w_fc.shape[0] == nx and w_proj.shape[0] == nf

    x2d = hidden_states.reshape(-1, nx)
    M = x2d.shape[0]

    if compute_dtype is not None:
        x2d = x2d.astype(compute_dtype)
        w_fc = w_fc.astype(compute_dtype)
        w_proj = w_proj.astype(compute_dtype)

    # Effective tile sizes: row (sublane) tiles multiples of 8, feature (lane)
    # tiles multiples of 128; never larger than the padded array extent.
    tm_eff = min(tm, _round_up(M, 8))
    tk_eff = min(tk, _round_up(nf, 128))
    tn_eff = min(tn, _round_up(n_out, 128))

    Mp = _round_up(M, tm_eff)
    nxp = _round_up(nx, 128)
    nfp = _round_up(nf, tk_eff)
    noutp = _round_up(n_out, tn_eff)

    # Zero padding keeps the math exact: padded hidden columns see zero weight
    # and zero bias -> relu(0)^2 = 0 -> contribute nothing to the second dot;
    # padded output columns / rows are sliced off below.
    x_p = jnp.pad(x2d, ((0, Mp - M), (0, nxp - nx)))
    w1_p = jnp.pad(w_fc, ((0, nxp - nx), (0, nfp - nf)))
    b1_p = jnp.pad(b_fc.astype(jnp.float32), (0, nfp - nf)).reshape(1, nfp)
    w2_p = jnp.pad(w_proj, ((0, nfp - nf), (0, noutp - n_out)))
    b2_p = jnp.pad(b_proj.astype(jnp.float32), (0, noutp - n_out)).reshape(1, noutp)

    grid = (Mp // tm_eff, noutp // tn_eff, nfp // tk_eff)

    flops = 2 * M * nf * (nx + n_out) + 3 * M * nf
    bytes_accessed = int(
        x_p.size * x_p.dtype.itemsize
        + w1_p.size * w1_p.dtype.itemsize
        + w2_p.size * w2_p.dtype.itemsize
        + b1_p.size * 4 + b2_p.size * 4
        + Mp * noutp * jnp.dtype(out_dtype).itemsize)

    out_p = pl.pallas_call(
        _mlp_kernel,
        out_shape=jax.ShapeDtypeStruct((Mp, noutp), out_dtype),
        grid_spec=pltpu.PrefetchScalarGridSpec(
            num_scalar_prefetch=0,
            grid=grid,
            in_specs=[
                pl.BlockSpec((tm_eff, nxp), lambda i, j, k: (i, 0)),
                pl.BlockSpec((nxp, tk_eff), lambda i, j, k: (0, k)),
                pl.BlockSpec((1, tk_eff), lambda i, j, k: (0, k)),
                pl.BlockSpec((tk_eff, tn_eff), lambda i, j, k: (k, j)),
                pl.BlockSpec((1, tn_eff), lambda i, j, k: (0, j)),
            ],
            out_specs=pl.BlockSpec((tm_eff, tn_eff), lambda i, j, k: (i, j)),
            scratch_shapes=[pltpu.VMEM((tm_eff, tn_eff), jnp.float32)],
        ),
        compiler_params=pltpu.CompilerParams(
            dimension_semantics=("parallel", "parallel", "arbitrary"),
            vmem_limit_bytes=vmem_limit_bytes,
        ),
        cost_estimate=pl.CostEstimate(
            flops=flops, transcendentals=0, bytes_accessed=bytes_accessed),
    )(x_p, w1_p, b1_p, w2_p, b2_p)

    out2d = out_p[:M, :n_out]
    return out2d.reshape(orig_shape[:-1] + (n_out,))


def _reference(hidden_states, w_fc, b_fc, w_proj, b_proj):
    h = hidden_states @ w_fc + b_fc
    h = jnp.square(jnp.maximum(h, 0.0))
    return h @ w_proj + b_proj


def _make_inputs(key, batch, seq, input_size, output_size):
    # Mirrors MLPParallel(input_size, output_size):
    #   c_fc   = Conv1D(nf=input_size,  nx=output_size) -> W1 (output_size, input_size)
    #   c_proj = Conv1D(nf=output_size, nx=input_size)  -> W2 (input_size, output_size)
    k_x, k_w1, k_b1, k_w2, k_b2 = jax.random.split(key, 5)
    nx = output_size
    nf = input_size
    n_out = output_size
    hidden_states = jax.random.normal(k_x, (batch, seq, nx), jnp.float32)
    w_fc = 0.02 * jax.random.normal(k_w1, (nx, nf), jnp.float32)
    b_fc = 0.01 * jax.random.normal(k_b1, (nf,), jnp.float32)
    w_proj = 0.02 * jax.random.normal(k_w2, (nf, n_out), jnp.float32)
    b_proj = 0.01 * jax.random.normal(k_b2, (n_out,), jnp.float32)
    return hidden_states, w_fc, b_fc, w_proj, b_proj


if __name__ == "__main__":
    # Test 1: module-default feature widths (256) at small batch/seq; lane
    # aligned, multi-step K reduction (tk=128 over nf=256) exercises the
    # accumulator init/finalize path.  fp32 compute.
    args = _make_inputs(jax.random.PRNGKey(0), batch=2, seq=8,
                        input_size=256, output_size=256)
    out = jax.block_until_ready(mlp_parallel_forward(*args, tk=128))
    ref = _reference(*args)
    assert out.shape == ref.shape
    assert jnp.allclose(out, ref, atol=1e-4, rtol=1e-4), "fp32 aligned mismatch"

    # Test 2: unaligned feature widths (40 / 48) -> exercises the zero-padding
    # path (lane width padded up to 128).  fp32 compute.
    args = _make_inputs(jax.random.PRNGKey(1), batch=2, seq=8,
                        input_size=48, output_size=40)
    out = jax.block_until_ready(mlp_parallel_forward(*args))
    ref = _reference(*args)
    assert out.shape == ref.shape
    assert jnp.allclose(out, ref, atol=1e-4, rtol=1e-4), "fp32 padded mismatch"

    # Test 3: bf16 MXU path with fp32 accumulation (looser tolerance vs the
    # fp32 reference).
    args = _make_inputs(jax.random.PRNGKey(2), batch=2, seq=8,
                        input_size=256, output_size=256)
    out = jax.block_until_ready(
        mlp_parallel_forward(*args, tk=128, compute_dtype=jnp.bfloat16))
    ref = _reference(*args)
    assert out.shape == ref.shape
    assert jnp.allclose(out, ref, atol=2e-2, rtol=5e-2), "bf16 mismatch"

    print("KERNEL_OK")
</pallas_src>

<mosaic_0001>
module attributes {stable_mosaic.version = 11 : i64} {
  func.func @_mlp_kernel(%arg0: i32, %arg1: i32, %arg2: i32, %arg3: memref<16x256xf32, #tpu.memory_space<vmem>>, %arg4: memref<256x128xf32, #tpu.memory_space<vmem>>, %arg5: memref<1x128xf32, #tpu.memory_space<vmem>>, %arg6: memref<128x256xf32, #tpu.memory_space<vmem>>, %arg7: memref<1x256xf32, #tpu.memory_space<vmem>>, %arg8: memref<16x256xf32, #tpu.memory_space<vmem>>, %arg9: memref<16x256xf32, #tpu.memory_space<vmem>>) attributes {dimension_semantics = [#tpu.dimension_semantics<parallel>, #tpu.dimension_semantics<parallel>, #tpu.dimension_semantics<arbitrary>], iteration_bounds = array<i64: 1, 1, 2>, scalar_prefetch = 0 : i64, scratch_operands = 1 : i64, tpu.core_type = #tpu.core_type<tc>, window_params = [{transform_indices = @transform_0, window_bounds = array<i64: 16, 256>}, {transform_indices = @transform_1, window_bounds = array<i64: 256, 128>}, {transform_indices = @transform_2, window_bounds = array<i64: 1, 128>}, {transform_indices = @transform_3, window_bounds = array<i64: 128, 256>}, {transform_indices = @transform_4, window_bounds = array<i64: 1, 256>}, {transform_indices = @transform_5, window_bounds = array<i64: 16, 256>}]} {
    %c0_i32 = arith.constant 0 : i32
    %0 = arith.cmpi eq, %arg2, %c0_i32 : i32
    %1 = arith.extui %0 : i1 to i32
    %c0_i32_0 = arith.constant 0 : i32
    %2 = arith.cmpi ne, %1, %c0_i32_0 : i32
    scf.if %2 {
      %cst_15 = arith.constant 0.000000e+00 : f32
      %20 = vector.broadcast %cst_15 : f32 to vector<16x256xf32>
      %c0_16 = arith.constant 0 : index
      %c0_17 = arith.constant 0 : index
      %21 = vector.load %arg9[%c0_16, %c0_17] : memref<16x256xf32, #tpu.memory_space<vmem>>, vector<16x256xf32>
      tpu.vector_store %arg9[%c0_16, %c0_17], %20 {strides = array<i32>} : memref<16x256xf32, #tpu.memory_space<vmem>>, vector<16x256xf32>,
    } else {
    }
    %c0 = arith.constant 0 : index
    %c0_1 = arith.constant 0 : index
    %3 = vector.load %arg3[%c0, %c0_1] : memref<16x256xf32, #tpu.memory_space<vmem>>, vector<16x256xf32>
    %c0_2 = arith.constant 0 : index
    %c0_3 = arith.constant 0 : index
    %4 = vector.load %arg4[%c0_2, %c0_3] : memref<256x128xf32, #tpu.memory_space<vmem>>, vector<256x128xf32>
    %cst = arith.constant dense<0.000000e+00> : vector<16x128xf32>
    %5 = tpu.matmul %3, %4, %cst {dimension_numbers = #tpu.dot_dimension_numbers<[1], [0], [0], [1], [0, 0, 1, 1], [], []>} : vector<16x256xf32>, vector<256x128xf32>, vector<16x128xf32> -> vector<16x128xf32>
    %c0_4 = arith.constant 0 : index
    %c0_5 = arith.constant 0 : index
    %6 = vector.load %arg5[%c0_4, %c0_5] : memref<1x128xf32, #tpu.memory_space<vmem>>, vector<1x128xf32>
    %7 = vector.broadcast %6 : vector<1x128xf32> to vector<16x128xf32>
    %8 = arith.addf %5, %7 : vector<16x128xf32>
    %cst_6 = arith.constant 0.000000e+00 : f32
    %9 = vector.broadcast %cst_6 : f32 to vector<16x128xf32>
    %10 = arith.maximumf %8, %9 : vector<16x128xf32>
    %11 = arith.mulf %10, %10 : vector<16x128xf32>
    %c0_7 = arith.constant 0 : index
    %c0_8 = arith.constant 0 : index
    %12 = vector.load %arg9[%c0_7, %c0_8] : memref<16x256xf32, #tpu.memory_space<vmem>>, vector<16x256xf32>
    %c0_9 = arith.constant 0 : index
    %c0_10 = arith.constant 0 : index
    %13 = vector.load %arg6[%c0_9, %c0_10] : memref<128x256xf32, #tpu.memory_space<vmem>>, vector<128x256xf32>
    %cst_11 = arith.constant dense<0.000000e+00> : vector<16x256xf32>
    %14 = tpu.matmul %11, %13, %cst_11 {dimension_numbers = #tpu.dot_dimension_numbers<[1], [0], [0], [1], [0, 0, 1, 1], [], []>} : vector<16x128xf32>, vector<128x256xf32>, vector<16x256xf32> -> vector<16x256xf32>
    %15 = arith.addf %12, %14 : vector<16x256xf32>
    %c0_12 = arith.constant 0 : index
    %c0_13 = arith.constant 0 : index
    %16 = vector.load %arg9[%c0_12, %c0_13] : memref<16x256xf32, #tpu.memory_space<vmem>>, vector<16x256xf32>
    tpu.vector_store %arg9[%c0_12, %c0_13], %15 {strides = array<i32>} : memref<16x256xf32, #tpu.memory_space<vmem>>, vector<16x256xf32>,
    %c1_i32 = arith.constant 1 : i32
    %17 = arith.cmpi eq, %arg2, %c1_i32 : i32
    %18 = arith.extui %17 : i1 to i32
    %c0_i32_14 = arith.constant 0 : i32
    %19 = arith.cmpi ne, %18, %c0_i32_14 : i32
    scf.if %19 {
      %c0_15 = arith.constant 0 : index
      %c0_16 = arith.constant 0 : index
      %20 = vector.load %arg9[%c0_15, %c0_16] : memref<16x256xf32, #tpu.memory_space<vmem>>, vector<16x256xf32>
      %c0_17 = arith.constant 0 : index
      %c0_18 = arith.constant 0 : index
      %21 = vector.load %arg7[%c0_17, %c0_18] : memref<1x256xf32, #tpu.memory_space<vmem>>, vector<1x256xf32>
      %22 = vector.broadcast %21 : vector<1x256xf32> to vector<16x256xf32>
      %23 = arith.addf %20, %22 : vector<16x256xf32>
      %c0_19 = arith.constant 0 : index
      %c0_20 = arith.constant 0 : index
      %24 = vector.load %arg8[%c0_19, %c0_20] : memref<16x256xf32, #tpu.memory_space<vmem>>, vector<16x256xf32>
      tpu.vector_store %arg8[%c0_19, %c0_20], %23 {strides = array<i32>} : memref<16x256xf32, #tpu.memory_space<vmem>>, vector<16x256xf32>,
    } else {
    }
    return
  }
  func.func @transform_0(%arg0: i32, %arg1: i32, %arg2: i32) -> (i32, i32) {
    %c0_i32 = arith.constant 0 : i32
    %c0_i32_0 = arith.constant 0 : i32
    return %arg0, %c0_i32 : i32, i32
  }
  func.func @transform_1(%arg0: i32, %arg1: i32, %arg2: i32) -> (i32, i32) {
    %c0_i32 = arith.constant 0 : i32
    %c0_i32_0 = arith.constant 0 : i32
    return %c0_i32, %arg2 : i32, i32
  }
  func.func @transform_2(%arg0: i32, %arg1: i32, %arg2: i32) -> (i32, i32) {
    %c0_i32 = arith.constant 0 : i32
    %c0_i32_0 = arith.constant 0 : i32
    return %c0_i32, %arg2 : i32, i32
  }
  func.func @transform_3(%arg0: i32, %arg1: i32, %arg2: i32) -> (i32, i32) {
    %c0_i32 = arith.constant 0 : i32
    return %arg2, %arg1 : i32, i32
  }
  func.func @transform_4(%arg0: i32, %arg1: i32, %arg2: i32) -> (i32, i32) {
    %c0_i32 = arith.constant 0 : i32
    %c0_i32_0 = arith.constant 0 : i32
    return %c0_i32, %arg1 : i32, i32
  }
  func.func @transform_5(%arg0: i32, %arg1: i32, %arg2: i32) -> (i32, i32) {
    %c0_i32 = arith.constant 0 : i32
    return %arg0, %arg1 : i32, i32
  }
}

</mosaic_0001>

<bundles_post_ra>
// kernel: tpu_custom_call.1
= control target key start
LH: loop header
LB: loop body
LE: loop exit
PB: predicated region body
PF: predicated region fallthrough
CT: control target
= control target key end

     0   :  { %s1523_s0 = inlined_call_operand.hbm [shape: f32[16,256], index: 0, kind: input, shape index: {}]   ;;  %s1524_s1 = inlined_call_operand.hbm [shape: f32[256,256], index: 1, kind: input, shape index: {}]   ;;  %s1525_s2 = inlined_call_operand.vmem [shape: f32[1,256], index: 2, kind: input, shape index: {}]   ;;  %s1526_s3 = inlined_call_operand.hbm [shape: f32[256,256], index: 3, kind: input, shape index: {}]   ;;  %s1527_s4 = inlined_call_operand.vmem [shape: f32[1,256], index: 4, kind: input, shape index: {}]   ;;  %s1528_s5 = inlined_call_operand.hbm [shape: f32[16,256], index: 5, kind: output, shape index: {}]  }
   0x1   :  { %1537 = sst [smem:[#allocation13_spill]] %s1524_s1 }
   0x2   :  { %10 = vsyncpa [#allocation4], 0 }
   0x3   :  { %11 = vsyncpa [#allocation7], 0 }
   0x4   :  { %13 = vsyncpa [#allocation7 + $0x1], 0 }
   0x5   :  { %14 = vsyncpa [#allocation5], 0  ;;  %s1207_s18 = smov 0   ;;  %s1209_s19 = smov 0  }
   0x6   :  { %s1211_s20 = smov 0   ;;  %s1213_s21 = smov 0  }
   0x7   :  { %s1215_s22 = smov 0   ;;  %s1217_s23 = smov 0  }
   0x8 LB: > { %s32_s24 = sadd.s32 1, %s1159_s22  ;;  %s72_s25 = sadd.s32 1, %s1151_s20  ;;  %s1163_s23 = sphi %s1217_s23, %s20_s23   ;;  %s1159_s22 = sphi %s1215_s22, %s1555_s22   ;;  %s1155_s21 = sphi %s1213_s21, %s1554_s21   ;;  %s1151_s20 = sphi %s1211_s20, %s1553_s20   ;;  %s1147_s19 = sphi %s1209_s19, %s1552_s19   ;;  %s1143_s18 = sphi %s1207_s18, %s1551_s18  }
   0x9   : > { %p33_p0 = scmp.ge.s32.totalorder %s32_s24, 2  ;;  %p79_p1 = scmp.ne.s32.totalorder %s1151_s20, %s1147_s19 }
   0xa   : > { %p80_p2 = scmp.eq.s32.totalorder %s1163_s23, 0  ;;  %p929_p4 = scmp.lt.s32.totalorder %s1163_s23, 2 }
   0xb   : > { %s1557_s24 = smov (%p33_p0, %s32_s24), 0  ;;  %s242_s27 = sand.u32 1, %s1163_s23  }
   0xc   : > { %p81_p3 = por %p80_p2, %p79_p1  ;;  %s69_s26 = ssub.s32 %s1159_s22, %s1557_s24 }
   0xd   : > { %p70_p5 = scmp.eq.s32.totalorder %s69_s26, 0  ;;  %s244_s28 = sand.u32 1, %s1151_s20  }
   0xe   : > { %s1252_s30 = sshll.u32 %s244_s28, 8  ;;  %s785_s6 = sshll.u32 %s1159_s22, 7 }
   0xf   : > { %s1250_s29 = scalar_select %p70_p5, %s1151_s20, %s72_s25  }
  0x10   : > { %s1538_s1 = sld [smem:[#allocation13_spill]]  ;;  %s246_s10 = scalar_lea.vmem [#allocation6], %s1252_s30 }
  0x11   : > { %s252_s11 = sshll.u32 %s246_s10, 4  ;;  %p1261_p6 = pnand %p929_p4, %p81_p3  ;;  %s1265_s11 = int_to_ptr.vmem [resolvable:$true] %s252_s11 }
  0x12   : > { %s1267_s13 = scalar_lea.sflag [#allocation7], %s242_s27 }
  0x13   : > { %s1539_s12 = scalar_select %p1261_p6, 1, 0 }
  0x14   : > { %p1532_p8 = pneg %p1261_p6 }
  0x16   : > { %s1258_s9 = scalar_lea.hbm %s1538_s1, %s785_s6  ;;  %s996_s17 = scalar_lea.hbm %s1538_s1, 8192 }
  0x17   : > { %s991_s14 = scalar_lea.hbm %s1258_s9, 4096  ;;  %p997_p11 = scmp.lt.u32.totalorder %s1258_s9, %s1538_s1 }
  0x18   : > { %p992_p7 = scmp.ne.s32.totalorder %s1258_s9, %s991_s14  ;;  %p998_p12 = scmp.lt.u32.totalorder %s996_s17, %s991_s14 }
  0x19   : > { %p1000_p0 = scmp.lt.u32.totalorder %s991_s14, %s1258_s9 }
  0x1a   : > { %p994_p9 = pnand %p1532_p8, %p992_p7  ;;  %p999_p13 = por %p998_p12, %p997_p11 }
  0x1c   : > { %p995_p10 = pneg %p994_p9  ;;  %p1001_p1 = por %p1000_p0, %p999_p13 }
  0x1e   : > { %p1002_p2 = pnand %p1001_p1, %p995_p10 }
  0x20   : > { %1005 = shalt.err (!%p1002_p2)
}
  0x21   : > { %s1006_s27 = scalar_lea.vmem %s1265_s11, 4096  ;;  %s1165_s28 = smov [#allocation6]  }
  0x22   : > { %p1007_p3 = scmp.ne.s32.totalorder %s1265_s11, %s1006_s27  ;;  %s1011_s6 = sshll.u32 %s1165_s28, 4  ;;  %s1012_s6 = int_to_ptr.vmem [resolvable:$false] %s1011_s6 }
  0x23   : > { %s1013_s7 = scalar_lea.vmem %s1012_s6, 8192  ;;  %p1014_p7 = scmp.lt.s32.totalorder %s1265_s11, %s1012_s6 }
  0x24   : > { %p1009_p4 = pnand %p1007_p3, %p1532_p8  ;;  %p1015_p9 = scmp.lt.s32.totalorder %s1013_s7, %s1006_s27 }
  0x26   : > { %p1010_p5 = pneg %p1009_p4  ;;  %p1016_p11 = por %p1015_p9, %p1014_p7 }
  0x28   : > { %p1017_p12 = pnand %p1016_p11, %p1010_p5 }
  0x2a   : > { %1020 = shalt.err (!%p1017_p12)
}
  0x2b   : > { %s1529_s8 = smov 256   ;;  %s1167_s10 = smov 128  }
  0x2c   : > { %s1168_s14 = smov 8   ;;  %s1297_s15 = sadd.s32 4294967295, %s1163_s23  }
  0x2d   : > { %924 = dma.hbm_to_vmem [thread:$0]  (!%p1261_p6), %s1258_s9, 4096, %s1265_s11, %s1267_s13, %s1529_s8, %s1167_s10, %s1168_s14  }
  0x2e   : > { %p85_p10 = scmp.ne.s32.totalorder %s1147_s19, %s1143_s18  ;;  %p1531_p13 = scmp.eq.s32.totalorder %s1297_s15, 0 }
  0x2f   : > { %p780_p0 = scmp.ge.s32.totalorder %s1163_s23, 1  ;;  %p204_p1 = scmp.lt.s32.totalorder %s1163_s23, 3 }
  0x30   : > { %p1306_p2 = por %p1531_p13, %p85_p10  ;;  %s1169_s9 = smov [#allocation3]  }
  0x31   : > { %p1310_p3 = pnand %p780_p0, %p204_p1  ;;  %s220_s11 = sshll.u32 %s1169_s9, 4  ;;  %s1314_s11 = int_to_ptr.vmem [resolvable:$true] %s220_s11 }
  0x32   : > { %s1540_s16 = scalar_select %p1306_p2, 1, 0 }
  0x33   : > { %s1541_s17 = scalar_select %p1310_p3, 1, 0 }
  0x34   : > { %p917_p4 = pneg %p1310_p3  ;;  %s802_s18 = sshll.u32 %s1159_s22, 12 }
  0x35   : > { %s272_s25 = scalar_lea.vmem [#allocation8], %s1252_s30  ;;  %s1329_s7 = scalar_lea.hbm %s1526_s3, %s802_s18 }
  0x36   : > { %s282_s26 = sshll.u32 %s272_s25, 4  ;;  %p1322_p5 = pnand %p917_p4, %p1531_p13  ;;  %s1331_s26 = int_to_ptr.vmem [resolvable:$true] %s282_s26 }
  0x37   : > { %s1021_s9 = scalar_lea.hbm %s1523_s0, 512 }
  0x38   : > { %p1022_p7 = scmp.ne.s32.totalorder %s1523_s0, %s1021_s9  ;;  %p1023_p9 = pneg %p1322_p5 }
  0x39   : > { %p1028_p10 = scmp.lt.u32.totalorder %s1021_s9, %s1523_s0 }
  0x3a   : > { %p1024_p11 = pnand %p1023_p9, %p1022_p7 }
  0x3c   : > { %p1025_p12 = pneg %p1024_p11 }
  0x3e   : > { %p1030_p0 = pnand %p1028_p10, %p1025_p12 }
  0x40   : > { %1033 = shalt.err (!%p1030_p0)
}
  0x41   : > { %s1034_s18 = scalar_lea.vmem %s1314_s11, 512  ;;  %p1042_p8 = scmp.lt.s32.totalorder %s1314_s11, %s1314_s11 }
  0x42   : > { %p1035_p1 = scmp.ne.s32.totalorder %s1314_s11, %s1034_s18  ;;  %p1043_p2 = scmp.lt.s32.totalorder %s1034_s18, %s1034_s18 }
  0x44   : > { %p1037_p4 = pnand %p1035_p1, %p1023_p9  ;;  %p1044_p3 = por %p1043_p2, %p1042_p8 }
  0x46   : > { %p1038_p13 = pneg %p1037_p4 }
  0x48   : > { %p1045_p6 = pnand %p1044_p3, %p1038_p13 }
  0x4a   : > { %1048 = shalt.err (!%p1045_p6)
}
  0x4b   : > { %s1170_s8 = smov 16   ;;  %s1543_s1 = smov 256  }
  0x4c   : > { %920 = dma.hbm_to_vmem [thread:$0]  (!%p1322_p5), %s1523_s0, 512, %s1314_s11, [#allocation4], %s1543_s1, %s1543_s1, %s1170_s8  }
  0x4d   : > { %s1049_s10 = scalar_lea.hbm %s1329_s7, 4096  ;;  %p1544_p13 = scmp.ne.s32.totalorder %s1539_s12, 0 }
  0x4e   : > { %p1050_p8 = scmp.ne.s32.totalorder %s1329_s7, %s1049_s10  ;;  %s1054_s9 = scalar_lea.hbm %s1526_s3, 8192 }
  0x4f   : > { %p1545_p6 = pneg %p1544_p13  ;;  %p1055_p7 = scmp.lt.u32.totalorder %s1329_s7, %s1526_s3 }
  0x50   : > { %p1056_p9 = scmp.lt.u32.totalorder %s1054_s9, %s1049_s10  ;;  %p1058_p12 = scmp.lt.u32.totalorder %s1049_s10, %s1329_s7 }
  0x51   : > { %p1052_p2 = pnand %p1050_p8, %p1545_p6 }
  0x52   : > { %p1057_p11 = por %p1056_p9, %p1055_p7 }
  0x53   : > { %p1053_p3 = pneg %p1052_p2 }
  0x54   : > { %p1059_p10 = por %p1058_p12, %p1057_p11 }
  0x56   : > { %p1060_p0 = pnand %p1059_p10, %p1053_p3 }
  0x58   : > { %1063 = shalt.err (!%p1060_p0)
}
  0x59   : > { %s1064_s11 = scalar_lea.vmem %s1331_s26, 4096  ;;  %p1546_p1 = pmov %p1545_p6 }
  0x5a   : > { %p1065_p5 = scmp.ne.s32.totalorder %s1331_s26, %s1064_s11  ;;  %s1171_s18 = smov [#allocation8]  }
  0x5b   : > { %s1069_s28 = sshll.u32 %s1171_s18, 4  ;;  %s1070_s28 = int_to_ptr.vmem [resolvable:$false] %s1069_s28 }
  0x5c   : > { %p1067_p4 = pnand %p1065_p5, %p1546_p1  ;;  %s1071_s6 = scalar_lea.vmem %s1070_s28, 8192 }
  0x5d   : > { %p1072_p6 = scmp.lt.s32.totalorder %s1331_s26, %s1070_s28  ;;  %p1073_p2 = scmp.lt.s32.totalorder %s1071_s6, %s1064_s11 }
  0x5e   : > { %p1068_p8 = pneg %p1067_p4 }
  0x5f   : > { %p1074_p7 = por %p1073_p2, %p1072_p6 }
  0x61   : > { %p1075_p9 = pnand %p1074_p7, %p1068_p8 }
  0x63   : > { %1078 = shalt.err (!%p1075_p9)
}
  0x64   : > { %927 = dma.hbm_to_vmem [thread:$0]  (!%p1544_p13), %s1329_s7, 4096, %s1331_s26, %s1267_s13, %s1543_s1, %s1543_s1, %s1170_s8  }
  0x65   : > { %p1547_p3 = scmp.ne.s32.totalorder %s1541_s17, 0 }
  0x66   : > { %p1548_p11 = scmp.eq.s32.totalorder (!%p1547_p3), %s1297_s15, 0 }
  0x67   : > { %294 = sbr.rel (%p1547_p3) target bundleno = 638 (0x27e), region = 40 }
  0x6e   : > { %1130 = dma.done.wait (%p1548_p11), [#allocation4], 512   ;;  %p1549_p12 = pmov %p1548_p11 }
  0x6f   : > { %s300_s12 = sand.u32 1, %s1297_s15   ;;  %s302_s10 = sand.u32 1, %s1147_s19  }
  0x70   : > { %1132 = vsyncadd (%p1549_p12), [#allocation4], 4294966784  ;;  %s792_s27 = sshll.u32 %s302_s10, 8  ;;  %s301_s14 = scalar_lea.sflag [#allocation7], %s300_s12 }
  0x71   : > { %s1392_s9 = scalar_lea.vmem [#allocation6], %s792_s27  ;;  %p1550_p10 = scmp.ne.s32.totalorder %s1540_s16, 0 }
  0x73   : > { %1134 = dma.done.wait (%p1550_p10), %s301_s14, 8192  }
  0x74   : > { %1136 = vsyncadd (%p1550_p10), %s301_s14, 4294959104  ;;  %p348_p13 = scmp.lt.s32.totalorder %s1155_s21, 1  ;;  %s1406_s8 = scalar_lea.vmem [#allocation8], %s792_s27 }
  0x75   : > { %p794_p0 = scmp.ne.s32.totalorder %s1155_s21, 0 }
  0x76   : > { %s1400_s13 = scalar_select %p348_p13, %s1155_s21, 1 }
  0x77   : > { %363 = sbr.rel (%p794_p0) target bundleno = 126 (0x7e), region = 56  ;;  %v1172_v0 = vmov (!%p794_p0), 0.0  }
  0x78   : > { %s350_s7 = scalar_lea.vmem %s1525_s2, %s1400_s13  ;;  %364 = vst [vmem:[#allocation2] sm:$0xff] (!%p794_p0), %v1172_v0  ;;  %365 = vst [vmem:[#allocation2 + $0x8] sm:$0xff] (!%p794_p0), %v1172_v0 }
  0x79   : > { %366 = vst [vmem:[#allocation2 + $0x10] sm:$0xff] (!%p794_p0), %v1172_v0  ;;  %367 = vst [vmem:[#allocation2 + $0x18] sm:$0xff] (!%p794_p0), %v1172_v0 }
  0x7e PF: > { %v388_v1 = vld [vmem:[%s1392_s9 + $0x80] sm:$0xff]  ;;  %v389_v2 = vld [vmem:[%s1392_s9 + $0x88] sm:$0xff]  ;;  %v390_v6 = vld [vmem:[%s1392_s9 + $0x90] sm:$0xff]  ;;  %p796_p5 = scmp.ne.s32.totalorder %s1155_s21, 1 }
  0x7f   : > { %v372_v3 = vld [vmem:[%s1392_s9] sm:$0xff]  ;;  %v841_v4 = vpack.c.bf16 %v389_v2, %v388_v1  ;;  %v373_v5 = vld [vmem:[%s1392_s9 + $0x8] sm:$0xff]  ;;  %v391_v7 = vld [vmem:[%s1392_s9 + $0x98] sm:$0xff] }
  0x80   : > { %v843_v8 = vpack.c.bf16 %v373_v5, %v372_v3  ;;  %v845_v9 = vpack.c.bf16 %v391_v7, %v390_v6  ;;  %v374_v10 = vld [vmem:[%s1392_s9 + $0x10] sm:$0xff]  ;;  %v375_v11 = vld [vmem:[%s1392_s9 + $0x18] sm:$0xff]  ;;  %v392_v12 = vld [vmem:[%s1392_s9 + $0xa0] sm:$0xff] }
  0x81   : > { %842 = vmatprep.subr.bf16.mxu0 %v841_v4  ;;  %v393_v13 = vld [vmem:[%s1392_s9 + $0xa8] sm:$0xff]  ;;  %v847_v14 = vpack.c.bf16 %v375_v11, %v374_v10  ;;  %v376_v16 = vld [vmem:[%s1392_s9 + $0x20] sm:$0xff]  ;;  %v394_v18 = vld [vmem:[%s1392_s9 + $0xb0] sm:$0xff] }
  0x82   : > { %844 = vmatpush3.bf16.msra.mxu0 %v843_v8  ;;  %v849_v15 = vpack.c.bf16 %v393_v13, %v392_v12  ;;  %v377_v17 = vld [vmem:[%s1392_s9 + $0x28] sm:$0xff]  ;;  %v395_v19 = vld [vmem:[%s1392_s9 + $0xb8] sm:$0xff]  ;;  %v378_v22 = vld [vmem:[%s1392_s9 + $0x30] sm:$0xff] }
  0x83   : > { %846 = vmatprep.subr.bf16.mxu0 %v845_v9  ;;  %v851_v20 = vpack.c.bf16 %v377_v17, %v376_v16  ;;  %v853_v21 = vpack.c.bf16 %v395_v19, %v394_v18  ;;  %v379_v23 = vld [vmem:[%s1392_s9 + $0x38] sm:$0xff]  ;;  %v396_v24 = vld [vmem:[%s1392_s9 + $0xc0] sm:$0xff]  ;;  %v397_v25 = vld [vmem:[%s1392_s9 + $0xc8] sm:$0xff] }
  0x84   : > { %v369_v26 = vld [vmem:[#allocation3 + $0x8] sm:$0xff]  ;;  %v380_v27 = vld [vmem:[%s1392_s9 + $0x40] sm:$0xff]  ;;  %v855_v29 = vpack.c.bf16 %v379_v23, %v378_v22  ;;  %v398_v30 = vld [vmem:[%s1392_s9 + $0xd0] sm:$0xff]  ;;  %v857_v35 = vpack.c.bf16 %v397_v25, %v396_v24 }
  0x85   : > { %v381_v28 = vld [vmem:[%s1392_s9 + $0x48] sm:$0xff]  ;;  %475 = vmatprep.mubr.f32.mxu0 %v369_v26  ;;  %v399_v31 = vld [vmem:[%s1392_s9 + $0xd8] sm:$0xff]  ;;  %v494_v34 = vld [vmem:[%s1406_s8] sm:$0xff] }
  0x86   : > { %848 = vmatpush3.bf16.msra.mxu0 %v847_v14  ;;  %v495_v32 = vld [vmem:[%s1406_s8 + $0x8] sm:$0xff]  ;;  %v497_v33 = vld [vmem:[%s1406_s8 + $0x18] sm:$0xff]  ;;  %v496_v37 = vld [vmem:[%s1406_s8 + $0x10] sm:$0xff]  ;;  %v859_v46 = vpack.c.bf16 %v381_v28, %v380_v27  ;;  %v861_v50 = vpack.c.bf16 %v399_v31, %v398_v30 }
  0x87   : > { %850 = vmatprep.subr.bf16.mxu0 %v849_v15  ;;  %v873_v36 = vpack.c.bf16 %v497_v33, %v495_v32  ;;  %v499_v38 = vld [vmem:[%s1406_s8 + $0x28] sm:$0xff]  ;;  %v501_v39 = vld [vmem:[%s1406_s8 + $0x38] sm:$0xff]  ;;  %v875_v40 = vpack.c.bf16 %v496_v37, %v494_v34  ;;  %v498_v42 = vld [vmem:[%s1406_s8 + $0x20] sm:$0xff]  ;;  %v1173_v37 = vmov 0.0  }
  0x88   : > { %v877_v41 = vpack.c.bf16 %v501_v39, %v499_v38  ;;  %v500_v43 = vld [vmem:[%s1406_s8 + $0x30] sm:$0xff]  ;;  %v503_v44 = vld [vmem:[%s1406_s8 + $0x48] sm:$0xff]  ;;  %v505_v45 = vld [vmem:[%s1406_s8 + $0x58] sm:$0xff]  ;;  %590 = vmatprep.mubr.f32.mxu1 %v1173_v37 }
  0x89   : > { %874 = vmatprep.subr.bf16.mxu1 %v873_v36  ;;  %v382_v47 = vld [vmem:[%s1392_s9 + $0x50] sm:$0xff]  ;;  %v383_v48 = vld [vmem:[%s1392_s9 + $0x58] sm:$0xff]  ;;  %v879_v49 = vpack.c.bf16 %v500_v43, %v498_v42  ;;  %v400_v51 = vld [vmem:[%s1392_s9 + $0xe0] sm:$0xff]  ;;  %v881_v52 = vpack.c.bf16 %v505_v45, %v503_v44 }
  0x8a   : > { %852 = vmatpush3.bf16.msra.mxu0 %v851_v20  ;;  %876 = vmatpush1.bf16.msra.mxu1 %v875_v40  ;;  %v502_v53 = vld [vmem:[%s1406_s8 + $0x40] sm:$0xff]  ;;  %v504_v54 = vld [vmem:[%s1406_s8 + $0x50] sm:$0xff]  ;;  %v401_v55 = vld [vmem:[%s1392_s9 + $0xe8] sm:$0xff]  ;;  %v863_v58 = vpack.c.bf16 %v383_v48, %v382_v47 }
  0x8b   : > { %854 = vmatprep.subr.bf16.mxu0 %v853_v21  ;;  %878 = vmatprep.subr.bf16.mxu1 %v877_v41  ;;  %v507_v56 = vld [vmem:[%s1406_s8 + $0x68] sm:$0xff]  ;;  %v509_v57 = vld [vmem:[%s1406_s8 + $0x78] sm:$0xff]  ;;  %v384_v59 = vld [vmem:[%s1392_s9 + $0x60] sm:$0xff]  ;;  %v883_v61 = vpack.c.bf16 %v504_v54, %v502_v53  ;;  %v865_v62 = vpack.c.bf16 %v401_v55, %v400_v51 }
  0x8c   : > { %v385_v60 = vld [vmem:[%s1392_s9 + $0x68] sm:$0xff]  ;;  %v402_v63 = vld [vmem:[%s1392_s9 + $0xf0] sm:$0xff]  ;;  %v885_v0 = vpack.c.bf16 %v509_v57, %v507_v56  ;;  %v506_v1 = vld [vmem:[%s1406_s8 + $0x60] sm:$0xff] }
  0x8d   : > { %v508_v2 = vld [vmem:[%s1406_s8 + $0x70] sm:$0xff]  ;;  %v403_v3 = vld [vmem:[%s1392_s9 + $0xf8] sm:$0xff]  ;;  %v511_v4 = vld [vmem:[%s1406_s8 + $0x88] sm:$0xff]  ;;  %v867_v6 = vpack.c.bf16 %v385_v60, %v384_v59 }
  0x8e   : > { %856 = vmatpush3.bf16.msra.mxu0 %v855_v29  ;;  %880 = vmatpush1.bf16.msra.mxu1 %v879_v49  ;;  %v513_v5 = vld [vmem:[%s1406_s8 + $0x98] sm:$0xff]  ;;  %v386_v7 = vld [vmem:[%s1392_s9 + $0x70] sm:$0xff]  ;;  %v887_v8 = vpack.c.bf16 %v508_v2, %v506_v1  ;;  %v869_v9 = vpack.c.bf16 %v403_v3, %v402_v63  ;;  %v510_v12 = vld [vmem:[%s1406_s8 + $0x80] sm:$0xff]  ;;  %v621_v63 = vlaneseq (!%p796_p5) }
  0x8f   : > { %858 = vmatprep.subr.bf16.mxu0 %v857_v35  ;;  %882 = vmatprep.subr.bf16.mxu1 %v881_v52  ;;  %v387_v10 = vld [vmem:[%s1392_s9 + $0x78] sm:$0xff]  ;;  %v889_v11 = vpack.c.bf16 %v513_v5, %v511_v4  ;;  %v512_v13 = vld [vmem:[%s1406_s8 + $0x90] sm:$0xff]  ;;  %v515_v14 = vld [vmem:[%s1406_s8 + $0xa8] sm:$0xff] }
  0x90   : > { %v517_v15 = vld [vmem:[%s1406_s8 + $0xb8] sm:$0xff]  ;;  %v871_v16 = vpack.c.bf16 %v387_v10, %v386_v7  ;;  %v891_v17 = vpack.c.bf16 %v512_v13, %v510_v12  ;;  %v514_v19 = vld [vmem:[%s1406_s8 + $0xa0] sm:$0xff]  ;;  %v516_v20 = vld [vmem:[%s1406_s8 + $0xb0] sm:$0xff] }
  0x91   : > { %v893_v18 = vpack.c.bf16 %v517_v15, %v515_v14  ;;  %v368_v21 = vld [vmem:[#allocation3] sm:$0xff]  ;;  %v895_v22 = vpack.c.bf16 %v516_v20, %v514_v19  ;;  %v371_v23 = vld [vmem:[#allocation3 + $0x18] sm:$0xff]  ;;  %v370_v24 = vld [vmem:[#allocation3 + $0x10] sm:$0xff] }
  0x92   : > { %860 = vmatpush3.bf16.msra.mxu0 %v859_v46  ;;  %884 = vmatpush1.bf16.msra.mxu1 %v883_v61  ;;  %v519_v25 = vld [vmem:[%s1406_s8 + $0xc8] sm:$0xff]  ;;  %v521_v26 = vld [vmem:[%s1406_s8 + $0xd8] sm:$0xff]  ;;  %v518_v28 = vld [vmem:[%s1406_s8 + $0xc0] sm:$0xff] }
  0x93   : > { %862 = vmatprep.subr.bf16.mxu0 %v861_v50  ;;  %886 = vmatprep.subr.bf16.mxu1 %v885_v0  ;;  %v897_v27 = vpack.c.bf16 %v521_v26, %v519_v25  ;;  %v520_v29 = vld [vmem:[%s1406_s8 + $0xd0] sm:$0xff]  ;;  %v523_v31 = vld [vmem:[%s1406_s8 + $0xe8] sm:$0xff]  ;;  %v525_v32 = vld [vmem:[%s1406_s8 + $0xf8] sm:$0xff]  ;;  %v622_v0 = vshrl.u32 (!%p796_p5), %v621_v63, 7 }
  0x94   : > { %v899_v30 = vpack.c.bf16 %v520_v29, %v518_v28  ;;  %v901_v33 = vpack.c.bf16 %v525_v32, %v523_v31  ;;  %v522_v34 = vld [vmem:[%s1406_s8 + $0xe0] sm:$0xff]  ;;  %v524_v35 = vld [vmem:[%s1406_s8 + $0xf0] sm:$0xff]  ;;  %v491_v52 = vld [vmem:[#allocation2 + $0x8] sm:$0xff] }
  0x95   : > { %v903_v36 = vpack.c.bf16 %v524_v35, %v522_v34  ;;  %v795_v39 = vld [vmem:[%s350_s7] ss:$0 sm:$0xff]  ;;  %v492_v57 = vld [vmem:[#allocation2 + $0x10] sm:$0xff]  ;;  %v623_v3 = vsub.s32 (!%p796_p5), 0, %v622_v0  ;;  %v627_v4 = vsub.s32 (!%p796_p5), 1, %v622_v0 }
  0x96   : > { %864 = vmatpush3.bf16.msra.mxu0 %v863_v58  ;;  %888 = vmatpush1.bf16.msra.mxu1 %v887_v8  ;;  %v490_v51 = vld [vmem:[#allocation2] sm:$0xff]  ;;  %v493_v58 = vld [vmem:[#allocation2 + $0x18] sm:$0xff] }
  0x97   : > { %866 = vmatprep.subr.bf16.mxu0 %v865_v62  ;;  %890 = vmatprep.subr.bf16.mxu1 %v889_v11  ;;  %v619_v1 = vld [vmem:[%s1527_s4] sm:$0x3] (!%p796_p5) }
  0x98   : > { %v624_v8 = vrot.slane (!%p796_p5), %v619_v1, %v623_v3 }
  0x9a   : > { %868 = vmatpush3.bf16.msra.mxu0 %v867_v6  ;;  %892 = vmatpush1.bf16.msra.mxu1 %v891_v17 }
  0x9b   : > { %870 = vmatprep.subr.bf16.mxu0 %v869_v9  ;;  %894 = vmatprep.subr.bf16.mxu1 %v893_v18  ;;  %v628_v9 = vrot.slane (!%p796_p5), %v619_v1, %v627_v4 }
  0x9e   : > { %872 = vmatpush3.bf16.msra.mxu0 %v871_v16  ;;  %896 = vmatpush1.bf16.msra.mxu1 %v895_v22 }
  0x9f   : > { %898 = vmatprep.subr.bf16.mxu1 %v897_v27 }
  0xa1   : > { %476 = vmatmul.mubr.f32.vlgmr.msra.gmra.mrb[0].mxu0 %v368_v21 }
  0xa2   : > { %480 = vmatprep.mubr.f32.mxu0 %v371_v23  ;;  %900 = vmatpush1.bf16.msra.mxu1 %v899_v30 }
  0xa3   : > { %902 = vmatprep.subr.bf16.mxu1 %v901_v33 }
  0xa5   : > { %481 = vmatmul.mubr.f32.gmra.mrb[2].mxu0 %v370_v24 }
  0xa6   : > { %904 = vmatpush1.bf16.msra.mxu1 %v903_v36 }
 0x174   : > { %v835_v38 = vpop.f32.mrb[0].mxu0 }
 0x175   : > { %v836_v40 = vpop.f32.mrb[1].mxu0 }
 0x176   : > { %v837_v41 = vadd.f32 %v836_v40, %v835_v38 }
 0x178   : > { %v478_v42 = vadd.f32 %v837_v41, %v795_v39  ;;  %v838_v43 = vpop.f32.mrb[2].mxu0 }
 0x179   : > { %v839_v44 = vpop.f32.mrb[3].mxu0 }
 0x17a   : > { %v486_v45 = vmax.f32 %v478_v42, 0.0  ;;  %v840_v46 = vadd.f32 %v839_v44, %v838_v43 }
 0x17c   : > { %v488_v47 = vmul.f32 %v486_v45, %v486_v45  ;;  %v483_v48 = vadd.f32 %v840_v46, %v795_v39 }
 0x17e   : > { %v487_v49 = vmax.f32 %v483_v48, 0.0  ;;  %591 = vmatmul.mubr.f32.vlgmr.msra.gmra.mrb[0].mxu1 %v488_v47 }
 0x17f   : > { %596 = vmatprep.mubr.f32.mxu1 %v1173_v37 }
 0x180   : > { %v489_v50 = vmul.f32 %v487_v49, %v487_v49 }
 0x182   : > { %597 = vmatmul.mubr.f32.gmra.mrb[2].mxu1 %v489_v50 }
 0x251   : > { %v592_v53 = vpop.f32.mrb[0].mxu1 }
 0x252   : > { %v603_v54 = vadd.f32 %v592_v53, %v490_v51  ;;  %v594_v55 = vpop.f32.mrb[1].mxu1 }
 0x253   : > { %v604_v56 = vadd.f32 %v594_v55, %v491_v52  ;;  %614 = sbr.rel (%p796_p5) target bundleno = 612 (0x264), region = 60 }
 0x254   : > { %607 = vst [vmem:[#allocation2] sm:$0xff] %v603_v54 }
 0x255   : > { %608 = vst [vmem:[#allocation2 + $0x8] sm:$0xff] %v604_v56  ;;  %v598_v59 = vpop.f32.mrb[2].mxu1 }
 0x256   : > { %v605_v60 = vadd.f32 %v598_v59, %v492_v57  ;;  %v600_v61 = vpop.f32.mrb[3].mxu1 }
 0x257   : > { %v606_v62 = vadd.f32 %v600_v61, %v493_v58 }
 0x258   : > { %609 = vst [vmem:[#allocation2 + $0x10] sm:$0xff] %v605_v60 }
 0x259   : > { %610 = vst [vmem:[#allocation2 + $0x18] sm:$0xff] %v606_v62 }
 0x25b   : > { %v615_v2 = vld [vmem:[#allocation2] sm:$0xff] }
 0x25c   : > { %v616_v5 = vld [vmem:[#allocation2 + $0x8] sm:$0xff]  ;;  %v631_v10 = vadd.f32 %v624_v8, %v615_v2 }
 0x25d   : > { %v632_v11 = vadd.f32 %v628_v9, %v616_v5 }
 0x25e   : > { %635 = vst [vmem:[#allocation9] sm:$0xff] %v631_v10 }
 0x25f   : > { %v617_v6 = vld [vmem:[#allocation2 + $0x10] sm:$0xff]  ;;  %636 = vst [vmem:[#allocation9 + $0x8] sm:$0xff] %v632_v11 }
 0x260   : > { %v618_v7 = vld [vmem:[#allocation2 + $0x18] sm:$0xff]  ;;  %v633_v12 = vadd.f32 %v624_v8, %v617_v6 }
 0x261   : > { %v634_v13 = vadd.f32 %v628_v9, %v618_v7 }
 0x262   : > { %637 = vst [vmem:[#allocation9 + $0x10] sm:$0xff] %v633_v12 }
 0x263   : > { %638 = vst [vmem:[#allocation9 + $0x18] sm:$0xff] %v634_v13 }
 0x264 PF: > { %p931_p1 = scmp.eq.s32.totalorder %s1297_s15, 1  ;;  %s1174_s21 = smov [#allocation9]  }
 0x265   : > { %s651_s11 = sshll.u32 %s1174_s21, 4  ;;  %s652_s11 = int_to_ptr.vmem [resolvable:$true] %s651_s11 }
 0x266   : > { %s1079_s18 = scalar_lea.vmem %s652_s11, 512  ;;  %p1086_p2 = scmp.lt.s32.totalorder %s652_s11, %s652_s11 }
 0x267   : > { %p1080_p4 = scmp.ne.s32.totalorder %s652_s11, %s1079_s18  ;;  %p1087_p7 = scmp.lt.s32.totalorder %s1079_s18, %s1079_s18 }
 0x269   : > { %p1081_p8 = pnand %p1080_p4, %p931_p1  ;;  %p1088_p9 = por %p1087_p7, %p1086_p2 }
 0x26b   : > { %p1082_p6 = pneg %p1081_p8 }
 0x26d   : > { %p1089_p3 = pnand %p1088_p9, %p1082_p6 }
 0x26f   : > { %1092 = shalt.err (!%p1089_p3)
}
 0x270   : > { %s1093_s12 = scalar_lea.hbm %s1528_s5, 512 }
 0x271   : > { %p1094_p11 = scmp.ne.s32.totalorder %s1528_s5, %s1093_s12  ;;  %p1099_p13 = scmp.lt.u32.totalorder %s1093_s12, %s1528_s5 }
 0x273   : > { %p1095_p12 = pnand %p1094_p11, %p931_p1 }
 0x275   : > { %p1096_p10 = pneg %p1095_p12 }
 0x277   : > { %p1101_p0 = pnand %p1099_p13, %p1096_p10 }
 0x279   : > { %1104 = shalt.err (!%p1101_p0)
}
 0x27a   : > { %s1175_s13 = smov 256   ;;  %s1176_s17 = smov 16  }
 0x27b   : > { %914 = dma.vmem_to_hbm [thread:$0]  (%p931_p1), %s652_s11, 512, %s1528_s5, [#allocation5], %s1175_s13, %s1175_s13, %s1176_s17  }
 0x27c   : > { %1138 = dma.done.wait (%p931_p1), [#allocation5], 512  }
 0x27d   : > { %1140 = vsyncadd (%p931_p1), [#allocation5], 4294966784 }
 0x27e PF: > { %s20_s23 = sadd.s32 1, %s1163_s23   ;;  %s1551_s18 = smov %s1147_s19 }
 0x27f   : > { %p17_p5 = scmp.ge.s32.totalorder %s20_s23, 4   ;;  %s1552_s19 = smov %s1151_s20 }
 0x280   : > { %s1553_s20 = smov %s1250_s29  ;;  %s1554_s21 = smov %s1159_s22 }
 0x281   : > { %s1555_s22 = smov %s1557_s24  ;;  %19 = sbr.rel (!%p17_p5) target bundleno = 8 (0x8), region = 109 }
 0x288   :  { %667 = vsyncpa [#allocation4], 1 }
 0x289   :  { %669 = vsyncpa [#allocation4 + $0x1], 1 }
 0x28a   :  { %670 = vsyncpa [#allocation7], 1 }
 0x28b   :  { %672 = vsyncpa [#allocation7 + $0x1], 1 }
 0x28c   :  { %673 = vsyncpa [#allocation5], 1 }
 0x28d   :  { %675 = vsyncpa [#allocation5 + $0x1], 1 }

</bundles_post_ra>
